<compile_context>
chip_gen: v5e
topology: v5e:2x2
jax: 0.10.0
libtpu: 0.0.40
codegen_flags: <defaults>
</compile_context>

<pallas_src>
import functools

import numpy as np
import jax
import jax.numpy as jnp
from jax.experimental import pallas as pl
from jax.experimental.pallas import tpu as pltpu

EPS = 1e-08
_ACC_ROWS = 8      # f32 vreg sublane height (accumulator fold granularity)
_ROW_CAP = 4096    # rows/block cap: well past the ~85-90% roofline plateau


def _kcl_kernel(p_ref, t_ref, out_ref, acc_ref, *, n_rows, n_cols,
                block_rows, block_cols, fold, mask_rows, mask_cols):
    """Grid step (i, j): reduce a [block_rows, block_cols] slab of
    target * (log(target+eps) - log(predict+eps)) into a per-row-block
    (fold, block_cols) f32 accumulator.
    i = row blocks ("parallel"), j = feature blocks ("arbitrary", innermost)."""
    i = pl.program_id(0)
    j = pl.program_id(1)

    @pl.when(j == 0)
    def _init():
        acc_ref[...] = jnp.zeros_like(acc_ref)

    p = p_ref[...].astype(jnp.float32)
    t = t_ref[...].astype(jnp.float32)
    # The two logs go to the EUP; everything else is VPU.
    # TODO(synk): if a v7x bundle dump shows the single EUP slot saturated,
    # replace one log with a VPU bitcast-exponent + polynomial fast-log.
    contrib = t * (jnp.log(t + EPS) - jnp.log(p + EPS))

    # Masks are statically elided when the block shape divides the array.
    # NOTE: log() of Pallas padding garbage is numerically safe only because
    # the selects below never propagate NaN/Inf from the unselected operand.
    if mask_rows:
        row = jax.lax.broadcasted_iota(jnp.int32, (block_rows, 1), 0) + i * block_rows
        contrib = jnp.where(row < n_rows, contrib, 0.0)
    if mask_cols:
        col = jax.lax.broadcasted_iota(jnp.int32, (1, block_cols), 1) + j * block_cols
        contrib = jnp.where(col < n_cols, contrib, 0.0)

    # Fold rows in groups of `fold` (sublane height): pure vreg-aligned VPU
    # adds; no cross-lane XLU reduce on the hot path.  The tiny final
    # reduction of the partial-sum slabs happens outside the kernel.
    acc_ref[...] += contrib.reshape(block_rows // fold, fold, block_cols).sum(axis=0)

    @pl.when(j == pl.num_programs(1) - 1)
    def _finalize():
        out_ref[...] = acc_ref[...]


def _vmem_capacity_bytes():
    try:
        return int(pltpu.get_tpu_info().vmem_capacity_bytes)
    except Exception:
        return 64 * 1024 * 1024   # conservative fallback (v7x per-core VMEM)


def _choose_blocks(n, d, itemsize, input_budget):
    """Pick (block_rows, block_cols) so that
       2 inputs x 2 pipeline buffers  +  output double-buffer  +  acc scratch
    stays within `input_budget`, sized by the real input dtype."""
    align = max(8, 32 // itemsize)            # sublane packing: f32->8, bf16->16, int8->32
    col_overhead = (2 + 1) * _ACC_ROWS * 4    # out double-buffer + acc scratch (f32) per column

    def rows_that_fit(td):
        rem = input_budget - col_overhead * td
        return max(0, rem // (2 * 2 * itemsize * td))

    # Feature-axis tiling only if even a minimum-height row block with the
    # full feature dim blows the budget (very large D).
    td = d
    if d > 128 and rows_that_fit(d) < align:
        td = input_budget // (2 * 2 * align * itemsize + col_overhead)
        td = max(128, (min(td, d) // 128) * 128)

    if n <= align:
        tm = n                                  # full (tiny) batch, exact block
    else:
        fit = rows_that_fit(td)
        if fit >= n and n <= _ROW_CAP:
            tm = n                              # whole batch in one block
        else:
            tm = max(align, (min(n, _ROW_CAP, max(fit, align)) // align) * align)
    return tm, td


def kcl_pallas(prob1, prob2, *, block_rows=None, block_cols=None):
    """Mirrors KCL.forward(prob1, prob2) -> scalar mean KL divergence."""
    assert prob1.ndim == 2, "Input dimension must be 2"
    assert prob1.shape == prob2.shape
    n, d = prob1.shape
    itemsize = jnp.dtype(prob1.dtype).itemsize

    vmem_cap = _vmem_capacity_bytes()
    # In-flight input budget (already counts 2 inputs x 2 pipeline buffers):
    # ~32 MiB on v7x (64 MiB VMEM/core), ~48 MiB on v5e/v6e (128 MiB VMEM).
    input_budget = min(vmem_cap // 2, 48 << 20)

    tm, td = _choose_blocks(n, d, itemsize, input_budget)
    if block_rows is not None:
        tm = block_rows
    if block_cols is not None:
        td = block_cols

    fold = _ACC_ROWS if tm % _ACC_ROWS == 0 else tm
    grid_rows = pl.cdiv(n, tm)
    grid_cols = pl.cdiv(d, td)
    mask_rows = (n % tm) != 0
    mask_cols = (d % td) != 0

    kernel = functools.partial(
        _kcl_kernel, n_rows=n, n_cols=d, block_rows=tm, block_cols=td,
        fold=fold, mask_rows=mask_rows, mask_cols=mask_cols)

    out_rows = grid_rows * fold
    out_bytes = out_rows * td * 4
    cost = pl.CostEstimate(
        flops=5 * n * d,
        transcendentals=2 * n * d,
        bytes_accessed=2 * n * d * itemsize + out_bytes)
    vmem_limit = int(max(16 << 20, min(vmem_cap - (4 << 20),
                                       input_budget + (16 << 20))))

    partials = pl.pallas_call(
        kernel,
        out_shape=jax.ShapeDtypeStruct((out_rows, td), jnp.float32),
        grid_spec=pltpu.PrefetchScalarGridSpec(
            num_scalar_prefetch=0,
            grid=(grid_rows, grid_cols),
            in_specs=[
                pl.BlockSpec((tm, td), lambda i, j: (i, j)),
                pl.BlockSpec((tm, td), lambda i, j: (i, j)),
            ],
            out_specs=pl.BlockSpec((fold, td), lambda i, j: (i, 0)),
            scratch_shapes=[pltpu.VMEM((fold, td), jnp.float32)],
        ),
        compiler_params=pltpu.CompilerParams(
            dimension_semantics=("parallel", "arbitrary"),
            vmem_limit_bytes=vmem_limit),
        cost_estimate=cost,
    )(prob1, prob2)

    # Tiny final reduction of the per-row-block partial sums; mean over rows.
    return jnp.sum(partials) / np.float32(n)


def _reference(prob1, prob2):
    """Pure-JAX reference of the PyTorch KCL forward."""
    p1 = prob1.astype(jnp.float32) + EPS
    t1 = prob2.astype(jnp.float32) + EPS
    kld = jnp.sum(prob2.astype(jnp.float32) * (jnp.log(t1) - jnp.log(p1)), axis=1)
    return jnp.mean(kld)


if __name__ == "__main__":
    key = jax.random.PRNGKey(0)

    def check(n, d, **kw):
        k1, k2 = jax.random.split(jax.random.fold_in(key, n * 1000 + d))
        prob1 = jax.nn.softmax(jax.random.normal(k1, (n, d), dtype=jnp.float32), -1)
        prob2 = jax.nn.softmax(jax.random.normal(k2, (n, d), dtype=jnp.float32), -1)
        out = kcl_pallas(prob1, prob2, **kw)
        jax.block_until_ready(out)
        ref = _reference(prob1, prob2)
        np.testing.assert_allclose(np.asarray(out), np.asarray(ref),
                                   rtol=1e-5, atol=1e-6)

    # Default small case: single block, no masking.
    check(8, 32)
    # Tiny batch (< sublane alignment): exact full-array block.
    check(2, 32)
    # Forced small blocks: multiple row/feature blocks with partial (masked)
    # edges, exercising the tiled + masked reduction paths.
    check(37, 160, block_rows=8, block_cols=128)

    print("KERNEL_OK")
</pallas_src>

<mosaic_0001>
module attributes {stable_mosaic.version = 11 : i64} {
  func.func @_kcl_kernel(%arg0: i32, %arg1: i32, %arg2: memref<8x32xf32, #tpu.memory_space<vmem>>, %arg3: memref<8x32xf32, #tpu.memory_space<vmem>>, %arg4: memref<8x32xf32, #tpu.memory_space<vmem>>, %arg5: memref<8x32xf32, #tpu.memory_space<vmem>>) attributes {dimension_semantics = [#tpu.dimension_semantics<parallel>, #tpu.dimension_semantics<arbitrary>], iteration_bounds = array<i64: 1, 1>, scalar_prefetch = 0 : i64, scratch_operands = 1 : i64, tpu.core_type = #tpu.core_type<tc>, window_params = [{transform_indices = @transform_0, window_bounds = array<i64: 8, 32>}, {transform_indices = @transform_1, window_bounds = array<i64: 8, 32>}, {transform_indices = @transform_2, window_bounds = array<i64: 8, 32>}]} {
    %c0_i32 = arith.constant 0 : i32
    %0 = arith.cmpi eq, %arg1, %c0_i32 : i32
    %1 = arith.extui %0 : i1 to i32
    %c0_i32_0 = arith.constant 0 : i32
    %2 = arith.cmpi ne, %1, %c0_i32_0 : i32
    scf.if %2 {
      %cst_12 = arith.constant 0.000000e+00 : f32
      %21 = vector.broadcast %cst_12 : f32 to vector<8x32xf32>
      %c0_13 = arith.constant 0 : index
      %c0_14 = arith.constant 0 : index
      %22 = vector.load %arg5[%c0_13, %c0_14] : memref<8x32xf32, #tpu.memory_space<vmem>>, vector<8x32xf32>
      tpu.vector_store %arg5[%c0_13, %c0_14], %21 {strides = array<i32>} : memref<8x32xf32, #tpu.memory_space<vmem>>, vector<8x32xf32>,
    } else {
    }
    %c0 = arith.constant 0 : index
    %c0_1 = arith.constant 0 : index
    %3 = vector.load %arg2[%c0, %c0_1] : memref<8x32xf32, #tpu.memory_space<vmem>>, vector<8x32xf32>
    %c0_2 = arith.constant 0 : index
    %c0_3 = arith.constant 0 : index
    %4 = vector.load %arg3[%c0_2, %c0_3] : memref<8x32xf32, #tpu.memory_space<vmem>>, vector<8x32xf32>
    %cst = arith.constant 9.99999993E-9 : f32
    %5 = vector.broadcast %cst : f32 to vector<8x32xf32>
    %6 = arith.addf %4, %5 : vector<8x32xf32>
    %7 = math.log %6 : vector<8x32xf32>
    %cst_4 = arith.constant 9.99999993E-9 : f32
    %8 = vector.broadcast %cst_4 : f32 to vector<8x32xf32>
    %9 = arith.addf %3, %8 : vector<8x32xf32>
    %10 = math.log %9 : vector<8x32xf32>
    %11 = arith.subf %7, %10 : vector<8x32xf32>
    %12 = arith.mulf %4, %11 : vector<8x32xf32>
    %c0_5 = arith.constant 0 : index
    %c0_6 = arith.constant 0 : index
    %13 = vector.load %arg5[%c0_5, %c0_6] : memref<8x32xf32, #tpu.memory_space<vmem>>, vector<8x32xf32>
    %14 = vector.shape_cast %12 : vector<8x32xf32> to vector<1x8x32xf32>
    %cst_7 = arith.constant dense<0.000000e+00> : vector<8x32xf32>
    %15 = vector.multi_reduction <add>, %14, %cst_7 [0] : vector<1x8x32xf32> to vector<8x32xf32>
    %16 = arith.addf %13, %15 : vector<8x32xf32>
    %c0_8 = arith.constant 0 : index
    %c0_9 = arith.constant 0 : index
    %17 = vector.load %arg5[%c0_8, %c0_9] : memref<8x32xf32, #tpu.memory_space<vmem>>, vector<8x32xf32>
    tpu.vector_store %arg5[%c0_8, %c0_9], %16 {strides = array<i32>} : memref<8x32xf32, #tpu.memory_space<vmem>>, vector<8x32xf32>,
    %c0_i32_10 = arith.constant 0 : i32
    %18 = arith.cmpi eq, %arg1, %c0_i32_10 : i32
    %19 = arith.extui %18 : i1 to i32
    %c0_i32_11 = arith.constant 0 : i32
    %20 = arith.cmpi ne, %19, %c0_i32_11 : i32
    scf.if %20 {
      %c0_12 = arith.constant 0 : index
      %c0_13 = arith.constant 0 : index
      %21 = vector.load %arg5[%c0_12, %c0_13] : memref<8x32xf32, #tpu.memory_space<vmem>>, vector<8x32xf32>
      %c0_14 = arith.constant 0 : index
      %c0_15 = arith.constant 0 : index
      %22 = vector.load %arg4[%c0_14, %c0_15] : memref<8x32xf32, #tpu.memory_space<vmem>>, vector<8x32xf32>
      tpu.vector_store %arg4[%c0_14, %c0_15], %21 {strides = array<i32>} : memref<8x32xf32, #tpu.memory_space<vmem>>, vector<8x32xf32>,
    } else {
    }
    return
  }
  func.func @transform_0(%arg0: i32, %arg1: i32) -> (i32, i32) {
    %c0_i32 = arith.constant 0 : i32
    return %arg0, %arg1 : i32, i32
  }
  func.func @transform_1(%arg0: i32, %arg1: i32) -> (i32, i32) {
    %c0_i32 = arith.constant 0 : i32
    return %arg0, %arg1 : i32, i32
  }
  func.func @transform_2(%arg0: i32, %arg1: i32) -> (i32, i32) {
    %c0_i32 = arith.constant 0 : i32
    %c0_i32_0 = arith.constant 0 : i32
    return %arg0, %c0_i32 : i32, i32
  }
}

</mosaic_0001>

<bundles_post_ra>
// kernel: tpu_custom_call.1
= control target key start
LH: loop header
LB: loop body
LE: loop exit
PB: predicated region body
PF: predicated region fallthrough
CT: control target
= control target key end

     0   :  { %7 = vsyncpa [#allocation4], 0  ;;  %s201_s0 = inlined_call_operand.hbm [shape: f32[8,32], index: 0, kind: input, shape index: {}]   ;;  %s202_s1 = inlined_call_operand.hbm [shape: f32[8,32], index: 1, kind: input, shape index: {}]   ;;  %s203_s2 = inlined_call_operand.hbm [shape: f32[8,32], index: 2, kind: output, shape index: {}]  }
   0x1   :  { %8 = vsyncpa [#allocation7], 0 }
   0x2   :  { %9 = vsyncpa [#allocation5], 0  ;;  %s15_s11 = sshll.u32 %s201_s0, 4  ;;  %s170_s12 = smov [#allocation3]   ;;  %s16_s11 = int_to_ptr.hbm [resolvable:$true] %s15_s11 }
   0x3   :  { %s17_s13 = sshll.u32 %s170_s12, 4  ;;  %s26_s16 = sshll.u32 %s202_s1, 4  ;;  %s18_s13 = int_to_ptr.vmem [resolvable:$true] %s17_s13  ;;  %s27_s16 = int_to_ptr.hbm [resolvable:$true] %s26_s16 }
   0x4   :  { %20 = dma.hbm_to_vmem [thread:$0]  %s16_s11, 128, %s18_s13, [#allocation4]  }
   0x5   :  { %s171_s17 = smov [#allocation6]  }
   0x6   :  { %s28_s18 = sshll.u32 %s171_s17, 4  ;;  %s29_s18 = int_to_ptr.vmem [resolvable:$true] %s28_s18 }
   0x7   :  { %31 = dma.hbm_to_vmem [thread:$0]  %s27_s16, 128, %s29_s18, [#allocation7]  }
   0x8   :  { %164 = dma.done.wait [#allocation4], 128  }
   0x9   :  { %165 = vsyncadd [#allocation4], 4294967168 }
   0xa   :  { %166 = dma.done.wait [#allocation7], 128  }
   0xb   :  { %167 = vsyncadd [#allocation7], 4294967168  ;;  %vm44_vm0 = vcmask 261120   ;;  %v172_v0 = vmov 0.0   ;;  %v46_v1 = vld [vmem:[#allocation3] sm:$0xff]  ;;  %v47_v2 = vld [vmem:[#allocation6] sm:$0xff] }
   0xc   :  { %45 = vst.msk [vmem:[#allocation2] sm:$0xff] %vm44_vm0, %v172_v0  ;;  %v48_v3 = vadd.f32 1e-08, %v47_v2  ;;  %v51_v4 = vadd.f32 1e-08, %v46_v1  ;;  %s173_s0 = smov [#allocation8]  }
   0xd   :  { %s71_s1 = sshll.u32 %s173_s0, 4  ;;  %s73_s21 = sshll.u32 %s203_s2, 4  ;;  %s72_s1 = int_to_ptr.vmem [resolvable:$true] %s71_s1  ;;  %s74_s21 = int_to_ptr.hbm [resolvable:$true] %s73_s21 }
   0xe   :  { %88 = vlog2.f32 %v48_v3 }
   0xf   :  { %90 = vlog2.f32 %v51_v4 }
  0x13   :  { %v56_v10 = vld [vmem:[#allocation2] sm:$0xff] }
  0x14   :  { %v89_v5 = vpop.eup %88 }
  0x15   :  { %v91_v6 = vpop.eup %90  ;;  %v50_v7 = vmul.f32 0.6931472, %v89_v5 }
  0x16   :  { %v53_v8 = vmul.f32 0.6931472, %v91_v6 }
  0x18   :  { %v54_v9 = vsub.f32 %v50_v7, %v53_v8 }
  0x1a   :  { %v55_v11 = vmul.f32 %v54_v9, %v47_v2 }
  0x1c   :  { %v58_v12 = vadd.f32 %v56_v10, %v55_v11 }
  0x1e   :  { %60 = vst.msk [vmem:[#allocation2] sm:$0xff] %vm44_vm0, %v58_v12 }
  0x25   :  { %v64_v13 = vld [vmem:[#allocation2] sm:$0xff] }
  0x26   :  { %65 = vst.msk [vmem:[#allocation8] sm:$0xff] %vm44_vm0, %v64_v13 }
  0x27   :  { %76 = dma.vmem_to_hbm [thread:$0]  %s72_s1, 128, %s74_s21, [#allocation5]  }
  0x28   :  { %168 = dma.done.wait [#allocation5], 128  }
  0x29   :  { %169 = vsyncadd [#allocation5], 4294967168 }
  0x2a   :  { %81 = vsyncpa [#allocation4], 1 }
  0x2b   :  { %82 = vsyncpa [#allocation7], 1 }
  0x2c   :  { %83 = vsyncpa [#allocation5], 1 }

</bundles_post_ra>
